<compile_context>
chip_gen: v6e
topology: v6e:2x2x1
jax: 0.10.0
libtpu: 0.0.40
codegen_flags: <defaults>
</compile_context>

<pallas_src>
import math
import numpy as np

import jax
import jax.numpy as jnp
from jax.experimental import pallas as pl
from jax.experimental.pallas import tpu as pltpu


# ----------------------------------------------------------------------------
# Pallas kernel: whole MVDML embedding (all views, all layers) in one body
# ----------------------------------------------------------------------------
def _make_fused_mlp_kernel(num_layers):
    """kernel(x_ref, w0, b0, w1, b1, ..., o_ref): chained matmul+bias+tanh."""

    def kernel(*refs):
        x_ref = refs[0]
        o_ref = refs[1 + 2 * num_layers]
        h = x_ref[...]
        for l in range(num_layers):
            w_ref = refs[1 + 2 * l]
            b_ref = refs[2 + 2 * l]
            h = jnp.dot(h, w_ref[...], preferred_element_type=jnp.float32)
            h = jnp.tanh(h + b_ref[...])
        o_ref[...] = h.astype(o_ref.dtype)

    return kernel


def fused_mlp(x, fused_params, *, block_b=256):
    """y = tanh(...tanh(x @ W0 + b0)... @ W_{L-1} + b_{L-1}) in one pallas_call.

    `fused_params` is a list of (W, b) with W:(K_l, N_l), b:(1, N_l); N_l is a
    multiple of 128 (lane-dense output slab).
    """
    B, K = x.shape
    num_layers = len(fused_params)
    n_out = fused_params[-1][0].shape[1]

    # Batch tiling: single block for small batches; row blocks (parallel grid
    # axis) for large batches so DMA pipelining / megacore sharding kick in.
    if B <= block_b or B % block_b != 0:
        bm = B
    else:
        bm = block_b
    grid = (pl.cdiv(B, bm),)

    in_specs = [pl.BlockSpec((bm, K), lambda i: (i, 0))]
    operands = [x]
    for w, b in fused_params:
        in_specs.append(pl.BlockSpec(w.shape, lambda i: (0, 0)))
        in_specs.append(pl.BlockSpec(b.shape, lambda i: (0, 0)))
        operands.extend([w, b])

    return pl.pallas_call(
        _make_fused_mlp_kernel(num_layers),
        out_shape=jax.ShapeDtypeStruct((B, n_out), jnp.float32),
        grid=grid,
        in_specs=in_specs,
        out_specs=pl.BlockSpec((bm, n_out), lambda i: (i, 0)),
        compiler_params=pltpu.CompilerParams(
            dimension_semantics=("parallel",),
        ),
    )(*operands)


# ----------------------------------------------------------------------------
# Parameter construction
# ----------------------------------------------------------------------------
def init_mlp_params(key, input_size, hidden_struct):
    """Per-view params, mimicking nn.Linear default init. W stored as (in, out)."""
    params = []
    dims = [input_size] + list(hidden_struct)
    for i in range(len(hidden_struct)):
        fan_in, fan_out = dims[i], dims[i + 1]
        key, kw, kb = jax.random.split(key, 3)
        bound = 1.0 / math.sqrt(fan_in)
        w = jax.random.uniform(kw, (fan_in, fan_out), jnp.float32, -bound, bound)
        b = jax.random.uniform(kb, (fan_out,), jnp.float32, -bound, bound)
        params.append((w, b))
    return params, key


def _pad128(n):
    return ((n + 127) // 128) * 128


def build_fused_params(per_view_params, input_sizes, hidden_struct):
    """Pack the three views' per-layer weights into block-diagonal, 128-lane
    padded slabs. Done once at init; forward just passes these arrays."""
    num_views = len(per_view_params)
    num_layers = len(hidden_struct)
    fused = []
    prev_npad = None
    for l in range(num_layers):
        h = hidden_struct[l]
        n = num_views * h
        npad = _pad128(n)
        if l == 0:
            kl = int(sum(input_sizes))
            row_off = np.concatenate([[0], np.cumsum(input_sizes)[:-1]]).astype(int)
        else:
            kl = prev_npad
            row_off = np.array([v * hidden_struct[l - 1] for v in range(num_views)])
        w_full = np.zeros((kl, npad), np.float32)
        b_full = np.zeros((1, npad), np.float32)
        for v in range(num_views):
            wv, bv = per_view_params[v][l]
            wv = np.asarray(wv)
            bv = np.asarray(bv)
            r0 = int(row_off[v])
            c0 = v * h
            w_full[r0:r0 + wv.shape[0], c0:c0 + h] = wv
            b_full[0, c0:c0 + h] = bv
        fused.append((jnp.asarray(w_full), jnp.asarray(b_full)))
        prev_npad = npad
    return fused


# ----------------------------------------------------------------------------
# Forward pass (MVDML_Embedding.forward)
# ----------------------------------------------------------------------------
def mvdml_embedding_forward(data, fused_params, hidden_struct):
    """Returns (emb_Ia, emb_Ie, emb_AC).  The view split is implicit in the
    block-diagonal layer-0 weight, so `data` is fed directly."""
    h_last = hidden_struct[-1]
    out = fused_mlp(data, fused_params)  # (B, pad128(3*h_last))
    return (out[:, 0:h_last],
            out[:, h_last:2 * h_last],
            out[:, 2 * h_last:3 * h_last])


# ----------------------------------------------------------------------------
# Main
# ----------------------------------------------------------------------------
if __name__ == "__main__":
    # Small, deterministic configuration.
    batch = 8
    input_size_Ia = 16
    input_size_Ie = 12
    input_size_AC = 20
    hidden_struct = [32, 32]

    key = jax.random.PRNGKey(0)
    key, kdata = jax.random.split(key)
    total_features = input_size_Ia + input_size_Ie + input_size_AC
    data = jax.random.normal(kdata, (batch, total_features), jnp.float32)

    params_Ia, key = init_mlp_params(key, input_size_Ia, hidden_struct)
    params_Ie, key = init_mlp_params(key, input_size_Ie, hidden_struct)
    params_AC, key = init_mlp_params(key, input_size_AC, hidden_struct)

    fused_params = build_fused_params(
        [params_Ia, params_Ie, params_AC],
        [input_size_Ia, input_size_Ie, input_size_AC],
        hidden_struct,
    )

    out_Ia, out_Ie, out_AC = mvdml_embedding_forward(data, fused_params, hidden_struct)
    jax.block_until_ready((out_Ia, out_Ie, out_AC))

    # Sanity check vs. pure-JAX reference (per-view, unfused math).
    def ref_mlp(x, params):
        for w, b in params:
            x = jnp.tanh(x @ w + b)
        return x

    ref_Ia = ref_mlp(data[:, :input_size_Ia], params_Ia)
    ref_Ie = ref_mlp(data[:, input_size_Ia:input_size_Ia + input_size_Ie], params_Ie)
    ref_AC = ref_mlp(data[:, input_size_Ia + input_size_Ie:], params_AC)

    assert out_Ia.shape == (batch, hidden_struct[-1])
    assert out_Ie.shape == (batch, hidden_struct[-1])
    assert out_AC.shape == (batch, hidden_struct[-1])
    assert jnp.allclose(out_Ia, ref_Ia, atol=2e-5)
    assert jnp.allclose(out_Ie, ref_Ie, atol=2e-5)
    assert jnp.allclose(out_AC, ref_AC, atol=2e-5)

    print("KERNEL_OK")
</pallas_src>

<mosaic_0001>
module attributes {stable_mosaic.version = 11 : i64} {
  func.func @kernel(%arg0: i32, %arg1: memref<8x48xf32, #tpu.memory_space<vmem>>, %arg2: memref<48x128xf32, #tpu.memory_space<vmem>>, %arg3: memref<1x128xf32, #tpu.memory_space<vmem>>, %arg4: memref<128x128xf32, #tpu.memory_space<vmem>>, %arg5: memref<1x128xf32, #tpu.memory_space<vmem>>, %arg6: memref<8x128xf32, #tpu.memory_space<vmem>>) attributes {dimension_semantics = [#tpu.dimension_semantics<parallel>], iteration_bounds = array<i64: 1>, scalar_prefetch = 0 : i64, scratch_operands = 0 : i64, tpu.core_type = #tpu.core_type<tc>, window_params = [{transform_indices = @transform_0, window_bounds = array<i64: 8, 48>}, {pipeline_mode = #tpu.pipeline_mode<synchronous>, transform_indices = @transform_1, window_bounds = array<i64: 48, 128>}, {pipeline_mode = #tpu.pipeline_mode<synchronous>, transform_indices = @transform_2, window_bounds = array<i64: 1, 128>}, {pipeline_mode = #tpu.pipeline_mode<synchronous>, transform_indices = @transform_3, window_bounds = array<i64: 128, 128>}, {pipeline_mode = #tpu.pipeline_mode<synchronous>, transform_indices = @transform_4, window_bounds = array<i64: 1, 128>}, {transform_indices = @transform_5, window_bounds = array<i64: 8, 128>}]} {
    %c0 = arith.constant 0 : index
    %c0_0 = arith.constant 0 : index
    %0 = vector.load %arg1[%c0, %c0_0] : memref<8x48xf32, #tpu.memory_space<vmem>>, vector<8x48xf32>
    %c0_1 = arith.constant 0 : index
    %c0_2 = arith.constant 0 : index
    %1 = vector.load %arg2[%c0_1, %c0_2] : memref<48x128xf32, #tpu.memory_space<vmem>>, vector<48x128xf32>
    %cst = arith.constant dense<0.000000e+00> : vector<8x128xf32>
    %2 = tpu.matmul %0, %1, %cst {dimension_numbers = #tpu.dot_dimension_numbers<[1], [0], [0], [1], [0, 0, 1, 1], [], []>} : vector<8x48xf32>, vector<48x128xf32>, vector<8x128xf32> -> vector<8x128xf32>
    %c0_3 = arith.constant 0 : index
    %c0_4 = arith.constant 0 : index
    %3 = vector.load %arg3[%c0_3, %c0_4] : memref<1x128xf32, #tpu.memory_space<vmem>>, vector<1x128xf32>
    %4 = vector.broadcast %3 : vector<1x128xf32> to vector<8x128xf32>
    %5 = arith.addf %2, %4 : vector<8x128xf32>
    %6 = math.tanh %5 : vector<8x128xf32>
    %c0_5 = arith.constant 0 : index
    %c0_6 = arith.constant 0 : index
    %7 = vector.load %arg4[%c0_5, %c0_6] : memref<128x128xf32, #tpu.memory_space<vmem>>, vector<128x128xf32>
    %cst_7 = arith.constant dense<0.000000e+00> : vector<8x128xf32>
    %8 = tpu.matmul %6, %7, %cst_7 {dimension_numbers = #tpu.dot_dimension_numbers<[1], [0], [0], [1], [0, 0, 1, 1], [], []>} : vector<8x128xf32>, vector<128x128xf32>, vector<8x128xf32> -> vector<8x128xf32>
    %c0_8 = arith.constant 0 : index
    %c0_9 = arith.constant 0 : index
    %9 = vector.load %arg5[%c0_8, %c0_9] : memref<1x128xf32, #tpu.memory_space<vmem>>, vector<1x128xf32>
    %10 = vector.broadcast %9 : vector<1x128xf32> to vector<8x128xf32>
    %11 = arith.addf %8, %10 : vector<8x128xf32>
    %12 = math.tanh %11 : vector<8x128xf32>
    %c0_10 = arith.constant 0 : index
    %c0_11 = arith.constant 0 : index
    %13 = vector.load %arg6[%c0_10, %c0_11] : memref<8x128xf32, #tpu.memory_space<vmem>>, vector<8x128xf32>
    tpu.vector_store %arg6[%c0_10, %c0_11], %12 {strides = array<i32>} : memref<8x128xf32, #tpu.memory_space<vmem>>, vector<8x128xf32>,
    return
  }
  func.func @transform_0(%arg0: i32) -> (i32, i32) {
    %c0_i32 = arith.constant 0 : i32
    %c0_i32_0 = arith.constant 0 : i32
    return %arg0, %c0_i32 : i32, i32
  }
  func.func @transform_1(%arg0: i32) -> (i32, i32) {
    %c0_i32 = arith.constant 0 : i32
    %c0_i32_0 = arith.constant 0 : i32
    %c0_i32_1 = arith.constant 0 : i32
    return %c0_i32, %c0_i32_0 : i32, i32
  }
  func.func @transform_2(%arg0: i32) -> (i32, i32) {
    %c0_i32 = arith.constant 0 : i32
    %c0_i32_0 = arith.constant 0 : i32
    %c0_i32_1 = arith.constant 0 : i32
    return %c0_i32, %c0_i32_0 : i32, i32
  }
  func.func @transform_3(%arg0: i32) -> (i32, i32) {
    %c0_i32 = arith.constant 0 : i32
    %c0_i32_0 = arith.constant 0 : i32
    %c0_i32_1 = arith.constant 0 : i32
    return %c0_i32, %c0_i32_0 : i32, i32
  }
  func.func @transform_4(%arg0: i32) -> (i32, i32) {
    %c0_i32 = arith.constant 0 : i32
    %c0_i32_0 = arith.constant 0 : i32
    %c0_i32_1 = arith.constant 0 : i32
    return %c0_i32, %c0_i32_0 : i32, i32
  }
  func.func @transform_5(%arg0: i32) -> (i32, i32) {
    %c0_i32 = arith.constant 0 : i32
    %c0_i32_0 = arith.constant 0 : i32
    return %arg0, %c0_i32 : i32, i32
  }
}

</mosaic_0001>

<bundles_post_ra>
// kernel: tpu_custom_call.1
= control target key start
LH: loop header
LB: loop body
LE: loop exit
PB: predicated region body
PF: predicated region fallthrough
CT: control target
= control target key end

     0   :  { %10 = vsyncpa [#allocation3], 0  ;;  %s515_s0 = inlined_call_operand.hbm [shape: f32[8,48], index: 0, kind: input, shape index: {}]   ;;  %s516_s1 = inlined_call_operand.hbm [shape: f32[48,128], index: 1, kind: input, shape index: {}]   ;;  %s517_s2 = inlined_call_operand.vmem [shape: f32[1,128], index: 2, kind: input, shape index: {}]   ;;  %s518_s3 = inlined_call_operand.hbm [shape: f32[128,128], index: 3, kind: input, shape index: {}]   ;;  %s519_s4 = inlined_call_operand.vmem [shape: f32[1,128], index: 4, kind: input, shape index: {}]   ;;  %s520_s5 = inlined_call_operand.hbm [shape: f32[8,128], index: 5, kind: output, shape index: {}]  }
   0x1   :  { %11 = vsyncpa [#allocation6], 0 }
   0x2   :  { %12 = vsyncpa [#allocation4], 0  ;;  %s435_s18 = smov [#allocation5]  }
   0x3   :  { %s28_s19 = sshll.u32 %s435_s18, 4  ;;  %s29_s19 = int_to_ptr.vmem [resolvable:$true] %s28_s19 }
   0x4   :  { %s357_s20 = scalar_lea.vmem %s29_s19, 768  ;;  %p362_p1 = scmp.lt.s32.totalorder %s29_s19, %s29_s19 }
   0x5   :  { %p358_p0 = scmp.ne.s32.totalorder %s29_s19, %s357_s20  ;;  %p363_p2 = scmp.lt.s32.totalorder %s357_s20, %s357_s20 }
   0x7   :  { %p364_p3 = por %p363_p2, %p362_p1 }
   0x9   :  { %p365_p4 = pnand %p364_p3, %p358_p0 }
   0xb   :  { %368 = shalt.err (!%p365_p4)
}
   0xc   :  { %s436_s21 = smov 128   ;;  %s437_s22 = smov 8  }
   0xd   :  { %34 = dma.hbm_to_vmem [thread:$0]  %s516_s1, 768, %s29_s19, [#allocation6], %s436_s21, %s436_s21, %s437_s22  }
   0xe   :  { %s438_s25 = smov [#allocation2]   ;;  %s439_s27 = smov [#allocation7]  }
   0xf   :  { %s19_s26 = sshll.u32 %s438_s25, 4  ;;  %s42_s28 = sshll.u32 %s439_s27, 4  ;;  %s20_s26 = int_to_ptr.vmem [resolvable:$true] %s19_s26  ;;  %s43_s28 = int_to_ptr.vmem [resolvable:$true] %s42_s28 }
  0x10   :  { %s377_s29 = scalar_lea.vmem %s20_s26, 128  ;;  %p382_p6 = scmp.lt.s32.totalorder %s20_s26, %s20_s26 }
  0x11   :  { %p378_p5 = scmp.ne.s32.totalorder %s20_s26, %s377_s29  ;;  %p383_p7 = scmp.lt.s32.totalorder %s377_s29, %s377_s29 }
  0x13   :  { %p384_p8 = por %p383_p7, %p382_p6 }
  0x15   :  { %p385_p9 = pnand %p384_p8, %p378_p5 }
  0x17   :  { %388 = shalt.err (!%p385_p9)
}
  0x18   :  { %22 = dma.hbm_to_vmem [thread:$0]  %s515_s0, 128, %s20_s26, [#allocation3]  }
  0x19   :  { %s397_s7 = scalar_lea.vmem %s43_s28, 2048  ;;  %p402_p11 = scmp.lt.s32.totalorder %s43_s28, %s43_s28 }
  0x1a   :  { %p398_p10 = scmp.ne.s32.totalorder %s43_s28, %s397_s7  ;;  %p403_p12 = scmp.lt.s32.totalorder %s397_s7, %s397_s7 }
  0x1c   :  { %p404_p13 = por %p403_p12, %p402_p11 }
  0x1e   :  { %p405_p0 = pnand %p404_p13, %p398_p10 }
  0x20   :  { %408 = shalt.err (!%p405_p0)
}
  0x21   :  { %48 = dma.hbm_to_vmem [thread:$0]  %s518_s3, 2048, %s43_s28, [#allocation6], %s436_s21, %s436_s21, %s437_s22  }
  0x22   :  { %429 = dma.done.wait [#allocation3], 128  }
  0x23   :  { %430 = vsyncadd [#allocation3], 4294967168 }
  0x24   :  { %431 = dma.done.wait [#allocation6], 2816  }
  0x25   :  { %432 = vsyncadd [#allocation6], 4294964480  ;;  %v440_v0 = vmov 0.0   ;;  %vm441_vm0 = vmmov 0   ;;  %v66_v1 = vld [vmem:[#allocation5 + $0x28] sm:$0xff]  ;;  %v65_v2 = vld [vmem:[#allocation5 + $0x20] sm:$0xff] }
  0x26   :  { %287 = vmatprep.subr.mxu0 %v440_v0  ;;  %299 = vmatprep.mubr.msk.f32.mxu0 %vm441_vm0, %v440_v0  ;;  %v64_v3 = vld [vmem:[#allocation5 + $0x18] sm:$0xff]  ;;  %v164_v4 = vld [vmem:[#allocation7 + $0x78] sm:$0xff]  ;;  %v163_v5 = vld [vmem:[#allocation7 + $0x70] sm:$0xff]  ;;  %vm74_vm1 = vcmask 392192   ;;  %s442_s11 = smov [#allocation8]  }
  0x27   :  { %302 = vmatprep.subr.mxu1 %v440_v0  ;;  %334 = vmatprep.mubr.msk.f32.mxu1 %vm441_vm0, %v440_v0  ;;  %v63_v6 = vld [vmem:[#allocation5 + $0x10] sm:$0xff]  ;;  %v162_v7 = vld [vmem:[#allocation7 + $0x68] sm:$0xff]  ;;  %v62_v8 = vld [vmem:[#allocation5 + $0x8] sm:$0xff]  ;;  %s250_s12 = sshll.u32 %s442_s11, 4  ;;  %s251_s12 = int_to_ptr.vmem [resolvable:$true] %s250_s12 }
  0x28   :  { %288 = vmatpush3.msra.mxu0 %v66_v1  ;;  %303 = vmatpush3.msra.mxu1 %v164_v4  ;;  %v161_v9 = vld [vmem:[#allocation7 + $0x60] sm:$0xff]  ;;  %v61_v10 = vld [vmem:[#allocation5] sm:$0xff]  ;;  %v160_v11 = vld [vmem:[#allocation7 + $0x58] sm:$0xff]  ;;  %p414_p2 = scmp.lt.s32.totalorder %s251_s12, %s251_s12 }
  0x29   :  { %289 = vmatprep.subr.mxu0 %v440_v0  ;;  %304 = vmatprep.subr.mxu1 %v440_v0  ;;  %v60_v12 = vld [vmem:[#allocation2] sm:$0xff]  ;;  %v159_v13 = vld [vmem:[#allocation7 + $0x50] sm:$0xff]  ;;  %v157_v15 = vld [vmem:[#allocation7 + $0x40] sm:$0xff] }
  0x2a   :  { %290 = vmatpush3.msra.mxu0 %v65_v2  ;;  %305 = vmatpush3.msra.mxu1 %v163_v5  ;;  %v158_v14 = vld [vmem:[#allocation7 + $0x48] sm:$0xff]  ;;  %v156_v16 = vld [vmem:[#allocation7 + $0x38] sm:$0xff]  ;;  %v155_v17 = vld [vmem:[#allocation7 + $0x30] sm:$0xff] }
  0x2b   :  { %291 = vmatprep.subr.mxu0 %v440_v0  ;;  %306 = vmatprep.subr.mxu1 %v440_v0  ;;  %v154_v18 = vld [vmem:[#allocation7 + $0x28] sm:$0xff]  ;;  %v153_v19 = vld [vmem:[#allocation7 + $0x20] sm:$0xff]  ;;  %v152_v20 = vld [vmem:[#allocation7 + $0x18] sm:$0xff] }
  0x2c   :  { %292 = vmatpush3.msra.mxu0 %v64_v3  ;;  %307 = vmatpush3.msra.mxu1 %v162_v7  ;;  %v151_v21 = vld [vmem:[#allocation7 + $0x10] sm:$0xff]  ;;  %v150_v22 = vld [vmem:[#allocation7 + $0x8] sm:$0xff]  ;;  %v149_v23 = vld [vmem:[#allocation7] sm:$0xff] }
  0x2d   :  { %293 = vmatprep.subr.mxu0 %v440_v0  ;;  %308 = vmatprep.subr.mxu1 %v440_v0  ;;  %v260_v24 = vld [vmem:[%s517_s2] ss:$0 sm:$0xff]  ;;  %s409_s2 = scalar_lea.vmem %s251_s12, 128 }
  0x2e   :  { %294 = vmatpush3.msra.mxu0 %v63_v6  ;;  %309 = vmatpush3.msra.mxu1 %v161_v9  ;;  %v262_v29 = vld [vmem:[%s519_s4] ss:$0 sm:$0xff]  ;;  %p410_p1 = scmp.ne.s32.totalorder %s251_s12, %s409_s2  ;;  %p415_p3 = scmp.lt.s32.totalorder %s409_s2, %s409_s2 }
  0x2f   :  { %295 = vmatprep.subr.mxu0 %v440_v0  ;;  %310 = vmatprep.subr.mxu1 %v440_v0 }
  0x30   :  { %296 = vmatpush3.msra.mxu0 %v62_v8  ;;  %311 = vmatpush3.msra.mxu1 %v160_v11  ;;  %p416_p4 = por %p415_p3, %p414_p2 }
  0x31   :  { %297 = vmatprep.subr.mxu0 %v440_v0  ;;  %312 = vmatprep.subr.mxu1 %v440_v0 }
  0x32   :  { %298 = vmatpush3.msra.mxu0 %v61_v10  ;;  %313 = vmatpush3.msra.mxu1 %v159_v13  ;;  %p417_p5 = pnand %p416_p4, %p410_p1 }
  0x33   :  { %300 = vmatmul.mubr.msk.f32.vlgmr.msra.gmra.mxu0 %vm74_vm1, %v60_v12  ;;  %314 = vmatprep.subr.mxu1 %v440_v0 }
  0x34   :  { %315 = vmatpush3.msra.mxu1 %v158_v14 }
  0x35   :  { %316 = vmatprep.subr.mxu1 %v440_v0 }
  0x36   :  { %317 = vmatpush3.msra.mxu1 %v157_v15 }
  0x37   :  { %318 = vmatprep.subr.mxu1 %v440_v0 }
  0x38   :  { %319 = vmatpush3.msra.mxu1 %v156_v16 }
  0x39   :  { %320 = vmatprep.subr.mxu1 %v440_v0 }
  0x3a   :  { %321 = vmatpush3.msra.mxu1 %v155_v17 }
  0x3b   :  { %322 = vmatprep.subr.mxu1 %v440_v0 }
  0x3c   :  { %323 = vmatpush3.msra.mxu1 %v154_v18 }
  0x3d   :  { %324 = vmatprep.subr.mxu1 %v440_v0 }
  0x3e   :  { %325 = vmatpush3.msra.mxu1 %v153_v19 }
  0x3f   :  { %326 = vmatprep.subr.mxu1 %v440_v0 }
  0x40   :  { %327 = vmatpush3.msra.mxu1 %v152_v20 }
  0x41   :  { %328 = vmatprep.subr.mxu1 %v440_v0 }
  0x42   :  { %329 = vmatpush3.msra.mxu1 %v151_v21 }
  0x43   :  { %330 = vmatprep.subr.mxu1 %v440_v0 }
  0x44   :  { %331 = vmatpush3.msra.mxu1 %v150_v22 }
  0x45   :  { %332 = vmatprep.subr.mxu1 %v440_v0 }
  0x46   :  { %333 = vmatpush3.msra.mxu1 %v149_v23 }
  0xf3   :  { %v144_v25 = vpop.f32.mrf.mxu0 }
  0xf4   :  { %v145_v26 = vadd.f32 %v260_v24, %v144_v25 }
  0xf5   :  { %v301_v27 = vpop.f32.mrf.mxu0 }
  0xf6   :  { %345 = vtanh.f32 %v145_v26 }
 0x103   :  { %v346_v28 = vpop.eup %345 }
 0x104   :  { %335 = vmatmul.mubr.f32.vlgmr.msra.gmra.mxu1 %v346_v28 }
 0x1c4   :  { %v238_v30 = vpop.f32.mrf.mxu1 }
 0x1c5   :  { %v239_v31 = vadd.f32 %v262_v29, %v238_v30 }
 0x1c6   :  { %v336_v32 = vpop.f32.mrf.mxu1 }
 0x1c7   :  { %347 = vtanh.f32 %v239_v31 }
 0x1d4   :  { %v348_v33 = vpop.eup %347 }
 0x1d5   :  { %243 = vst [vmem:[#allocation8] sm:$0xff] %v348_v33 }
 0x1d6   :  { %420 = shalt.err (!%p417_p5)
}
 0x1d7   :  { %253 = dma.vmem_to_hbm [thread:$0]  %s251_s12, 128, %s520_s5, [#allocation4]  }
 0x1d8   :  { %433 = dma.done.wait [#allocation4], 128  }
 0x1d9   :  { %434 = vsyncadd [#allocation4], 4294967168 }
 0x1da   :  { %257 = vsyncpa [#allocation3], 1 }
 0x1db   :  { %258 = vsyncpa [#allocation6], 1 }
 0x1dc   :  { %259 = vsyncpa [#allocation4], 1 }

</bundles_post_ra>
